<compile_context>
chip_gen: v5e
topology: v5e:2x2
jax: 0.10.0
libtpu: 0.0.40
codegen_flags: <defaults>
</compile_context>

<pallas_src>
import functools
import math

import jax
import jax.numpy as jnp
from jax import lax
from jax.experimental import pallas as pl
from jax.experimental.pallas import tpu as pltpu


LN_EPS = 1e-5  # PyTorch nn.LayerNorm default


def _round_up(x, n):
    return ((x + n - 1) // n) * n


def _device_limits():
    """(default row tile, VMEM byte cap) tuned per TPU generation."""
    try:
        kind = jax.devices()[0].device_kind.lower()
    except Exception:
        kind = ""
    if any(v in kind for v in ("v4", "v5", "v6")):
        return 1024, 100 * (1 << 20)   # 128 MiB physical VMEM parts
    return 512, 48 * (1 << 20)         # v7x (64 MiB physical) and unknown parts


def _vmem_bytes(tm, d_in, d_out_p, d_ff_p, x_item, w_item):
    """Rough VMEM footprint: double-buffered I/O + resident weights + f32 temps."""
    wide = d_out_p + d_ff_p
    weights = 2 * (d_in * wide + d_ff_p * d_out_p) * w_item      # default 2x buffers
    vectors = 2 * (wide + 3 * d_out_p) * 4                        # biases/ln params
    io = 2 * tm * (d_in + d_out_p) * x_item                       # x / out tiles
    interm = tm * (wide + d_ff_p + 4 * d_out_p) * 4               # ph, h, y, s, normed
    return weights + vectors + io + interm


def _feature_mixing_kernel(x_ref, wf_ref, bf_ref, w2_ref, b2_ref, g_ref, beta_ref,
                           o_ref, *, out_dim, out_dim_p):
    # One tile of rows; all (lane-padded) weights resident in VMEM.
    x = x_ref[...].astype(wf_ref.dtype)            # bf16 operands into the MXU

    # Fused projection + fc1: one MXU pass over the shared x tile (RHS = wp | w1).
    ph = jnp.dot(x, wf_ref[...], preferred_element_type=jnp.float32)
    ph = ph + bf_ref[...].astype(jnp.float32)
    x_proj = ph[:, :out_dim_p]                      # slice at a 128-lane boundary
    h = jnp.maximum(ph[:, out_dim_p:], 0.0)         # relu (f32)

    # fc2: bf16 operands, f32 accumulation.
    y = jnp.dot(h.astype(w2_ref.dtype), w2_ref[...],
                preferred_element_type=jnp.float32)
    y = y + b2_ref[...].astype(jnp.float32)

    # dropout: identity in eval mode.
    # TODO(synk): training-mode dropout (pltpu.prng_random_bits mask) not emitted.

    s = x_proj + y   # pad lanes stay exactly zero (zero-padded weights/biases)

    # LayerNorm over the true out_dim lanes (pad lanes masked out of the stats).
    inv_n = 1.0 / out_dim
    mean = jnp.sum(s, axis=-1, keepdims=True) * inv_n
    diff = s - mean
    if out_dim != out_dim_p:
        lane = lax.broadcasted_iota(jnp.int32, s.shape, 1)
        diff = jnp.where(lane < out_dim, diff, 0.0)
    var = jnp.sum(diff * diff, axis=-1, keepdims=True) * inv_n
    normed = diff * lax.rsqrt(var + LN_EPS)          # rsqrt on EUP

    o_ref[...] = (normed * g_ref[...].astype(jnp.float32)
                  + beta_ref[...].astype(jnp.float32)).astype(o_ref.dtype)


@functools.partial(jax.jit, static_argnames=("output_dim", "tm"))
def _feature_mixing_impl(x, wf, bf, w2, b2, gamma, beta, *, output_dim, tm):
    *lead, input_dim = x.shape
    m = math.prod(lead) if lead else 1
    d_ff_p, d_out_p = w2.shape

    default_tm, vmem_cap = _device_limits()
    tm = default_tm if tm is None else max(8, tm)

    # Balanced row tiling (minimal padding); >= 2 tiles so both v7x TCs get work.
    n_tiles = max(1, pl.cdiv(m, tm))
    if n_tiles == 1 and m >= 16:
        n_tiles = 2
    tm_eff = _round_up(pl.cdiv(m, n_tiles), 8)
    # Shrink the tile if large feature dims would blow the (v7x-safe) VMEM budget.
    while tm_eff > 64 and _vmem_bytes(tm_eff, input_dim, d_out_p, d_ff_p,
                                      x.dtype.itemsize,
                                      wf.dtype.itemsize) > 0.75 * vmem_cap:
        tm_eff = _round_up(tm_eff // 2, 8)
    n_tiles = pl.cdiv(m, tm_eff)
    m_pad = n_tiles * tm_eff

    x2 = x.reshape(m, input_dim)
    if m_pad != m:                       # skipped entirely when rows divide
        x2 = jnp.pad(x2, ((0, m_pad - m), (0, 0)))

    est = _vmem_bytes(tm_eff, input_dim, d_out_p, d_ff_p,
                      x.dtype.itemsize, wf.dtype.itemsize)
    vmem_limit = int(min(vmem_cap, max(16 * (1 << 20), 1.3 * est + (2 << 20))))

    const = lambda i: (0, 0)
    kern = functools.partial(_feature_mixing_kernel,
                             out_dim=output_dim, out_dim_p=d_out_p)

    out2 = pl.pallas_call(
        kern,
        out_shape=jax.ShapeDtypeStruct((m_pad, d_out_p), x.dtype),
        grid_spec=pltpu.PrefetchScalarGridSpec(
            num_scalar_prefetch=0,
            grid=(n_tiles,),
            in_specs=[
                # x rows: last block dim == full array dim, so no feature padding.
                pl.BlockSpec((tm_eff, input_dim), lambda i: (i, 0)),
                pl.BlockSpec((input_dim, d_out_p + d_ff_p), const),  # wp | w1
                pl.BlockSpec((1, d_out_p + d_ff_p), const),          # bp | b1
                pl.BlockSpec((d_ff_p, d_out_p), const),              # w2
                pl.BlockSpec((1, d_out_p), const),                   # b2
                pl.BlockSpec((1, d_out_p), const),                   # ln gamma
                pl.BlockSpec((1, d_out_p), const),                   # ln beta
            ],
            out_specs=pl.BlockSpec((tm_eff, d_out_p), lambda i: (i, 0)),
        ),
        compiler_params=pltpu.CompilerParams(
            dimension_semantics=("parallel",),
            vmem_limit_bytes=vmem_limit),
    )(x2, wf, bf, w2, b2, gamma, beta)

    out = out2
    if m_pad != m or d_out_p != output_dim:   # no-op slice when already exact
        out = out2[:m, :output_dim]
    return out.reshape(*lead, output_dim)


def feature_mixing(x, prep, *, tm=None, training=False):
    """Forward pass. `prep` comes from prepare_params (fused/padded/bf16 weights)."""
    if training:
        # TODO(synk): training-mode dropout mask via pltpu.prng_random_bits.
        raise NotImplementedError("FeatureMixing Pallas kernel is eval-mode only.")
    return _feature_mixing_impl(x, prep["wf"], prep["bf"], prep["w2"], prep["b2"],
                                prep["gamma"], prep["beta"],
                                output_dim=prep["output_dim"], tm=tm)


def prepare_params(params, compute_dtype=jnp.bfloat16):
    """One-time weight fusion / lane padding / dtype cast (hoisted out of forward).

    Pad lanes of every weight/bias/gamma/beta are zero-filled; the kernel's
    LayerNorm masking relies on this.
    """
    input_dim, output_dim = params["wp"].shape
    ff_dim = params["w1"].shape[1]
    d_out_p = _round_up(output_dim, 128)
    d_ff_p = _round_up(ff_dim, 128)

    def padc(a, cols):  # zero-pad last dim
        return jnp.pad(a, ((0, 0), (0, cols - a.shape[1])))

    wf = jnp.concatenate([padc(params["wp"], d_out_p),
                          padc(params["w1"], d_ff_p)], axis=1).astype(compute_dtype)
    bf = jnp.concatenate([padc(params["bp"], d_out_p),
                          padc(params["b1"], d_ff_p)], axis=1).astype(jnp.float32)
    w2 = jnp.pad(params["w2"], ((0, d_ff_p - ff_dim),
                                (0, d_out_p - output_dim))).astype(compute_dtype)
    b2 = padc(params["b2"], d_out_p).astype(jnp.float32)
    gamma = padc(params["gamma"], d_out_p).astype(jnp.float32)
    beta = padc(params["beta"], d_out_p).astype(jnp.float32)
    return {"wf": wf, "bf": bf, "w2": w2, "b2": b2, "gamma": gamma, "beta": beta,
            "output_dim": output_dim}


def init_params(key, input_dim, output_dim, ff_dim, dtype=jnp.float32):
    ks = jax.random.split(key, 6)
    scale_p = 1.0 / math.sqrt(input_dim)
    scale_2 = 1.0 / math.sqrt(ff_dim)
    return {
        # stored (in_dim, out_dim): kernel computes x @ W (== PyTorch x @ W_pt.T)
        "wp": jax.random.uniform(ks[0], (input_dim, output_dim), dtype,
                                 -scale_p, scale_p),
        "bp": jax.random.uniform(ks[1], (1, output_dim), dtype, -scale_p, scale_p),
        "w1": jax.random.uniform(ks[2], (input_dim, ff_dim), dtype,
                                 -scale_p, scale_p),
        "b1": jax.random.uniform(ks[3], (1, ff_dim), dtype, -scale_p, scale_p),
        "w2": jax.random.uniform(ks[4], (ff_dim, output_dim), dtype,
                                 -scale_2, scale_2),
        "b2": jax.random.uniform(ks[5], (1, output_dim), dtype, -scale_2, scale_2),
        "gamma": jnp.ones((1, output_dim), dtype),
        "beta": jnp.zeros((1, output_dim), dtype),
    }


def _reference(x, p, compute_dtype=jnp.bfloat16):
    """f32 reference using the same bf16-rounded matmul operands as the kernel."""
    cast = lambda a: a.astype(compute_dtype).astype(jnp.float32)
    xr = cast(x)
    x_proj = xr @ cast(p["wp"]) + p["bp"][0]
    h = jnp.maximum(xr @ cast(p["w1"]) + p["b1"][0], 0.0)
    y = cast(h) @ cast(p["w2"]) + p["b2"][0]
    s = x_proj + y
    mean = s.mean(-1, keepdims=True)
    var = ((s - mean) ** 2).mean(-1, keepdims=True)
    return (s - mean) / jnp.sqrt(var + LN_EPS) * p["gamma"][0] + p["beta"][0]


if __name__ == "__main__":
    key = jax.random.PRNGKey(0)
    k_x, k_p, k_x2, k_p2 = jax.random.split(key, 4)

    # Case 1: nominal module shapes (batch, channels, seq_len, input_dim).
    batch, channels, seq_len = 2, 4, 8
    input_dim, output_dim, ff_dim = 32, 32, 64
    x = jax.random.normal(k_x, (batch, channels, seq_len, input_dim), jnp.float32)
    params = init_params(k_p, input_dim, output_dim, ff_dim)
    prep = prepare_params(params)          # one-time: fuse, pad, cast to bf16

    out = jax.block_until_ready(feature_mixing(x, prep))
    ref = _reference(x, params)
    assert out.shape == (batch, channels, seq_len, output_dim)
    assert jnp.allclose(out, ref, atol=2e-2, rtol=2e-2), \
        float(jnp.max(jnp.abs(out - ref)))

    # Case 2: non-divisible rows and unaligned feature dims (exercise padding).
    xb = jax.random.normal(k_x2, (3, 5, 7, 24), jnp.float32)
    pb = init_params(k_p2, 24, 40, 72)
    prepb = prepare_params(pb)
    outb = jax.block_until_ready(feature_mixing(xb, prepb))
    refb = _reference(xb, pb)
    assert outb.shape == (3, 5, 7, 40)
    assert jnp.allclose(outb, refb, atol=2e-2, rtol=2e-2), \
        float(jnp.max(jnp.abs(outb - refb)))

    print("KERNEL_OK")
</pallas_src>

<mosaic_0001>
module attributes {stable_mosaic.version = 11 : i64} {
  func.func @_feature_mixing_kernel(%arg0: i32, %arg1: memref<32x32xf32, #tpu.memory_space<vmem>>, %arg2: memref<32x256xbf16, #tpu.memory_space<vmem>>, %arg3: memref<1x256xf32, #tpu.memory_space<vmem>>, %arg4: memref<128x128xbf16, #tpu.memory_space<vmem>>, %arg5: memref<1x128xf32, #tpu.memory_space<vmem>>, %arg6: memref<1x128xf32, #tpu.memory_space<vmem>>, %arg7: memref<1x128xf32, #tpu.memory_space<vmem>>, %arg8: memref<32x128xf32, #tpu.memory_space<vmem>>) attributes {dimension_semantics = [#tpu.dimension_semantics<parallel>], iteration_bounds = array<i64: 2>, scalar_prefetch = 0 : i64, scratch_operands = 0 : i64, tpu.core_type = #tpu.core_type<tc>, window_params = [{transform_indices = @transform_0, window_bounds = array<i64: 32, 32>}, {pipeline_mode = #tpu.pipeline_mode<synchronous>, transform_indices = @transform_1, window_bounds = array<i64: 32, 256>}, {pipeline_mode = #tpu.pipeline_mode<synchronous>, transform_indices = @transform_2, window_bounds = array<i64: 1, 256>}, {pipeline_mode = #tpu.pipeline_mode<synchronous>, transform_indices = @transform_3, window_bounds = array<i64: 128, 128>}, {pipeline_mode = #tpu.pipeline_mode<synchronous>, transform_indices = @transform_4, window_bounds = array<i64: 1, 128>}, {pipeline_mode = #tpu.pipeline_mode<synchronous>, transform_indices = @transform_5, window_bounds = array<i64: 1, 128>}, {pipeline_mode = #tpu.pipeline_mode<synchronous>, transform_indices = @transform_6, window_bounds = array<i64: 1, 128>}, {transform_indices = @transform_7, window_bounds = array<i64: 32, 128>}]} {
    %c0 = arith.constant 0 : index
    %c0_0 = arith.constant 0 : index
    %0 = vector.load %arg1[%c0, %c0_0] : memref<32x32xf32, #tpu.memory_space<vmem>>, vector<32x32xf32>
    %1 = arith.truncf %0 : vector<32x32xf32> to vector<32x32xbf16>
    %c0_1 = arith.constant 0 : index
    %c0_2 = arith.constant 0 : index
    %2 = vector.load %arg2[%c0_1, %c0_2] : memref<32x256xbf16, #tpu.memory_space<vmem>>, vector<32x256xbf16>
    %cst = arith.constant dense<0.000000e+00> : vector<32x256xf32>
    %3 = tpu.matmul %1, %2, %cst {dimension_numbers = #tpu.dot_dimension_numbers<[1], [0], [0], [1], [0, 0, 1, 1], [], []>} : vector<32x32xbf16>, vector<32x256xbf16>, vector<32x256xf32> -> vector<32x256xf32>
    %c0_3 = arith.constant 0 : index
    %c0_4 = arith.constant 0 : index
    %4 = vector.load %arg3[%c0_3, %c0_4] : memref<1x256xf32, #tpu.memory_space<vmem>>, vector<1x256xf32>
    %5 = vector.broadcast %4 : vector<1x256xf32> to vector<32x256xf32>
    %6 = arith.addf %3, %5 : vector<32x256xf32>
    %7 = vector.extract_strided_slice %6 {offsets = [0, 0], sizes = [32, 128], strides = [1, 1]} : vector<32x256xf32> to vector<32x128xf32>
    %8 = vector.extract_strided_slice %6 {offsets = [0, 128], sizes = [32, 128], strides = [1, 1]} : vector<32x256xf32> to vector<32x128xf32>
    %cst_5 = arith.constant 0.000000e+00 : f32
    %9 = vector.broadcast %cst_5 : f32 to vector<32x128xf32>
    %10 = arith.maximumf %8, %9 : vector<32x128xf32>
    %11 = arith.truncf %10 : vector<32x128xf32> to vector<32x128xbf16>
    %c0_6 = arith.constant 0 : index
    %c0_7 = arith.constant 0 : index
    %12 = vector.load %arg4[%c0_6, %c0_7] : memref<128x128xbf16, #tpu.memory_space<vmem>>, vector<128x128xbf16>
    %cst_8 = arith.constant dense<0.000000e+00> : vector<32x128xf32>
    %13 = tpu.matmul %11, %12, %cst_8 {dimension_numbers = #tpu.dot_dimension_numbers<[1], [0], [0], [1], [0, 0, 1, 1], [], []>} : vector<32x128xbf16>, vector<128x128xbf16>, vector<32x128xf32> -> vector<32x128xf32>
    %c0_9 = arith.constant 0 : index
    %c0_10 = arith.constant 0 : index
    %14 = vector.load %arg5[%c0_9, %c0_10] : memref<1x128xf32, #tpu.memory_space<vmem>>, vector<1x128xf32>
    %15 = vector.broadcast %14 : vector<1x128xf32> to vector<32x128xf32>
    %16 = arith.addf %13, %15 : vector<32x128xf32>
    %17 = arith.addf %7, %16 : vector<32x128xf32>
    %cst_11 = arith.constant dense<0.000000e+00> : vector<32xf32>
    %18 = vector.multi_reduction <add>, %17, %cst_11 [1] : vector<32x128xf32> to vector<32xf32>
    %19 = vector.shape_cast %18 : vector<32xf32> to vector<32x1xf32>
    %cst_12 = arith.constant 3.125000e-02 : f32
    %20 = vector.broadcast %cst_12 : f32 to vector<32x1xf32>
    %21 = arith.mulf %19, %20 : vector<32x1xf32>
    %22 = vector.broadcast %21 : vector<32x1xf32> to vector<32x128xf32>
    %23 = arith.subf %17, %22 : vector<32x128xf32>
    %24 = tpu.iota {dimensions = array<i32: 1>} : vector<32x128xi32>
    %c32_i32 = arith.constant 32 : i32
    %25 = vector.broadcast %c32_i32 : i32 to vector<32x128xi32>
    %26 = arith.cmpi slt, %24, %25 : vector<32x128xi32>
    %cst_13 = arith.constant 0.000000e+00 : f32
    %27 = vector.broadcast %cst_13 : f32 to vector<32x128xf32>
    %28 = arith.select %26, %23, %27 : vector<32x128xi1>, vector<32x128xf32>
    %29 = arith.mulf %28, %28 : vector<32x128xf32>
    %cst_14 = arith.constant dense<0.000000e+00> : vector<32xf32>
    %30 = vector.multi_reduction <add>, %29, %cst_14 [1] : vector<32x128xf32> to vector<32xf32>
    %31 = vector.shape_cast %30 : vector<32xf32> to vector<32x1xf32>
    %cst_15 = arith.constant 3.125000e-02 : f32
    %32 = vector.broadcast %cst_15 : f32 to vector<32x1xf32>
    %33 = arith.mulf %31, %32 : vector<32x1xf32>
    %cst_16 = arith.constant 9.99999974E-6 : f32
    %34 = vector.broadcast %cst_16 : f32 to vector<32x1xf32>
    %35 = arith.addf %33, %34 : vector<32x1xf32>
    %36 = math.rsqrt %35 : vector<32x1xf32>
    %37 = vector.broadcast %36 : vector<32x1xf32> to vector<32x128xf32>
    %38 = arith.mulf %28, %37 : vector<32x128xf32>
    %c0_17 = arith.constant 0 : index
    %c0_18 = arith.constant 0 : index
    %39 = vector.load %arg6[%c0_17, %c0_18] : memref<1x128xf32, #tpu.memory_space<vmem>>, vector<1x128xf32>
    %40 = vector.broadcast %39 : vector<1x128xf32> to vector<32x128xf32>
    %41 = arith.mulf %38, %40 : vector<32x128xf32>
    %c0_19 = arith.constant 0 : index
    %c0_20 = arith.constant 0 : index
    %42 = vector.load %arg7[%c0_19, %c0_20] : memref<1x128xf32, #tpu.memory_space<vmem>>, vector<1x128xf32>
    %43 = vector.broadcast %42 : vector<1x128xf32> to vector<32x128xf32>
    %44 = arith.addf %41, %43 : vector<32x128xf32>
    %c0_21 = arith.constant 0 : index
    %c0_22 = arith.constant 0 : index
    %45 = vector.load %arg8[%c0_21, %c0_22] : memref<32x128xf32, #tpu.memory_space<vmem>>, vector<32x128xf32>
    tpu.vector_store %arg8[%c0_21, %c0_22], %44 {strides = array<i32>} : memref<32x128xf32, #tpu.memory_space<vmem>>, vector<32x128xf32>,
    return
  }
  func.func @transform_0(%arg0: i32) -> (i32, i32) {
    %c0_i32 = arith.constant 0 : i32
    %c0_i32_0 = arith.constant 0 : i32
    return %arg0, %c0_i32 : i32, i32
  }
  func.func @transform_1(%arg0: i32) -> (i32, i32) {
    %c0_i32 = arith.constant 0 : i32
    %c0_i32_0 = arith.constant 0 : i32
    %c0_i32_1 = arith.constant 0 : i32
    return %c0_i32, %c0_i32_0 : i32, i32
  }
  func.func @transform_2(%arg0: i32) -> (i32, i32) {
    %c0_i32 = arith.constant 0 : i32
    %c0_i32_0 = arith.constant 0 : i32
    %c0_i32_1 = arith.constant 0 : i32
    return %c0_i32, %c0_i32_0 : i32, i32
  }
  func.func @transform_3(%arg0: i32) -> (i32, i32) {
    %c0_i32 = arith.constant 0 : i32
    %c0_i32_0 = arith.constant 0 : i32
    %c0_i32_1 = arith.constant 0 : i32
    return %c0_i32, %c0_i32_0 : i32, i32
  }
  func.func @transform_4(%arg0: i32) -> (i32, i32) {
    %c0_i32 = arith.constant 0 : i32
    %c0_i32_0 = arith.constant 0 : i32
    %c0_i32_1 = arith.constant 0 : i32
    return %c0_i32, %c0_i32_0 : i32, i32
  }
  func.func @transform_5(%arg0: i32) -> (i32, i32) {
    %c0_i32 = arith.constant 0 : i32
    %c0_i32_0 = arith.constant 0 : i32
    %c0_i32_1 = arith.constant 0 : i32
    return %c0_i32, %c0_i32_0 : i32, i32
  }
  func.func @transform_6(%arg0: i32) -> (i32, i32) {
    %c0_i32 = arith.constant 0 : i32
    %c0_i32_0 = arith.constant 0 : i32
    %c0_i32_1 = arith.constant 0 : i32
    return %c0_i32, %c0_i32_0 : i32, i32
  }
  func.func @transform_7(%arg0: i32) -> (i32, i32) {
    %c0_i32 = arith.constant 0 : i32
    %c0_i32_0 = arith.constant 0 : i32
    return %arg0, %c0_i32 : i32, i32
  }
}

</mosaic_0001>

<bundles_post_ra>
// kernel: _feature_mixing_impl.1
= control target key start
LH: loop header
LB: loop body
LE: loop exit
PB: predicated region body
PF: predicated region fallthrough
CT: control target
= control target key end

     0   :  { %s1308_s0 = inlined_call_operand.hbm [shape: f32[64,32], index: 0, kind: input, shape index: {}]   ;;  %s1309_s1 = inlined_call_operand.hbm [shape: bf16[32,256], index: 1, kind: input, shape index: {}]   ;;  %s1310_s2 = inlined_call_operand.vmem [shape: f32[1,256], index: 2, kind: input, shape index: {}]   ;;  %s1311_s3 = inlined_call_operand.hbm [shape: bf16[128,128], index: 3, kind: input, shape index: {}]   ;;  %s1312_s4 = inlined_call_operand.vmem [shape: f32[1,128], index: 4, kind: input, shape index: {}]   ;;  %s1313_s5 = inlined_call_operand.vmem [shape: f32[1,128], index: 5, kind: input, shape index: {}]   ;;  %s1314_s6 = inlined_call_operand.vmem [shape: f32[1,128], index: 6, kind: input, shape index: {}]   ;;  %s1315_s7 = inlined_call_operand.hbm [shape: f32[64,128], index: 7, kind: output, shape index: {}]  }
   0x1   :  { %1318 = sst [smem:[#allocation12_spill]] %s1309_s1 }
   0x2   :  { %12 = vsyncpa [#allocation3], 0 }
   0x3   :  { %14 = vsyncpa [#allocation3 + $0x1], 0 }
   0x4   :  { %15 = vsyncpa [#allocation6], 0 }
   0x5   :  { %16 = vsyncpa [#allocation4], 0 }
   0x6   :  { %18 = vsyncpa [#allocation4 + $0x1], 0  ;;  %s1114_s24 = smov 0   ;;  %s1116_s25 = smov 0  }
   0x7   :  { %s1118_s26 = smov 0   ;;  %s1120_s27 = smov 0  }
   0x8 LB: > { %s1135_s28 = sadd.s32 4294967295, %s1064_s27   ;;  %s728_s29 = sadd.s32 4294967294, %s1064_s27   ;;  %s1064_s27 = sphi %s1120_s27, %s1331_s27   ;;  %s1060_s26 = sphi %s1118_s26, %s1330_s26   ;;  %s1056_s25 = sphi %s1116_s25, %s1329_s25   ;;  %s1052_s24 = sphi %s1114_s24, %s1328_s24  }
   0x9   : > { %p44_p0 = scmp.ne.s32.totalorder %s1056_s25, %s1052_s24  ;;  %p45_p1 = scmp.eq.s32.totalorder %s1135_s28, 0 }
   0xa   : > { %p194_p2 = scmp.eq.s32.totalorder %s1135_s28, 1  ;;  %p200_p3 = scmp.eq.s32.totalorder %s728_s29, 1 }
   0xb   : > { %p1144_p4 = por %p45_p1, %p44_p0  ;;  %p729_p5 = scmp.ge.s32.totalorder %s1064_s27, 1 }
   0xc   : > { %p1149_p6 = por %p200_p3, %p44_p0  ;;  %p207_p7 = scmp.lt.s32.totalorder %s1064_s27, 3 }
   0xd   : > { %s1321_s1 = sld [smem:[#allocation12_spill]]  ;;  %s1066_s13 = smov [#allocation5]  }
   0xe   : > { %p1157_p8 = pnand %p729_p5, %p207_p7  ;;  %s220_s14 = sshll.u32 %s1066_s13, 4  ;;  %s221_s14 = int_to_ptr.vmem [resolvable:$true] %s220_s14 }
   0xf   : > { %s235_s17 = sshll.u32 %s1311_s3, 4  ;;  %s1316_s18 = smov 128   ;;  %s236_s17 = int_to_ptr.hbm [resolvable:$true] %s235_s17 }
  0x10   : > { %p832_p9 = pneg %p1157_p8  ;;  %s1317_s19 = smov 8  }
  0x11   : > { %s1069_s20 = smov [#allocation7]   ;;  %s1070_s22 = smov 64  }
  0x12   : > { %p833_p10 = pnand %p832_p9, %p45_p1  ;;  %s237_s21 = sshll.u32 %s1069_s20, 4  ;;  %s238_s21 = int_to_ptr.vmem [resolvable:$true] %s237_s21 }
  0x13   : > { %s218_s11 = sshll.u32 %s1321_s1, 4  ;;  %s1071_s23 = smov 4   ;;  %s219_s11 = int_to_ptr.hbm [resolvable:$true] %s218_s11 }
  0x14   : > { %835 = dma.hbm_to_vmem [thread:$0]  (!%p833_p10), %s219_s11, 512, %s221_s14, [#allocation6], %s1316_s18, %s1316_s18, %s1317_s19  }
  0x15   : > { %838 = dma.hbm_to_vmem [thread:$0]  (!%p833_p10), %s236_s17, 1024, %s238_s21, [#allocation6], %s1070_s22, %s1070_s22, %s1071_s23  }
  0x16   : > { %s1173_s29 = sadd.s32 1, %s1064_s27   ;;  %s31_s10 = sadd.s32 1, %s1060_s26 }
  0x17   : > { %s28_s9 = ssub.s32 %s1064_s27, %s1173_s29  ;;  %p38_p13 = scmp.ne.s32.totalorder %s1060_s26, %s1056_s25 }
  0x18   : > { %p29_p12 = scmp.eq.s32.totalorder %s28_s9, 0  ;;  %p39_p0 = scmp.eq.s32.totalorder %s1064_s27, 0 }
  0x19   : > { %p1186_p5 = por %p194_p2, %p38_p13  ;;  %p849_p7 = scmp.lt.s32.totalorder %s1064_s27, 2 }
  0x1a   : > { %s1182_s13 = scalar_select %p29_p12, %s1060_s26, %s31_s10  }
  0x1b   : > { %p40_p3 = por %p39_p0, %p38_p13  ;;  %s260_s14 = sand.u32 1, %s1060_s26  }
  0x1c   : > { %s733_s15 = sshll.u32 %s260_s14, 5  ;;  %s798_s16 = sshll.u32 %s1064_s27, 5 }
  0x1d   : > { %s269_s21 = scalar_lea.hbm %s1308_s0, %s798_s16  ;;  %s264_s22 = scalar_lea.vmem [#allocation2], %s733_s15 }
  0x1e   : > { %s272_s23 = sshll.u32 %s264_s22, 4  ;;  %s270_s9 = sshll.u32 %s269_s21, 4  ;;  %s273_s23 = int_to_ptr.vmem [resolvable:$true] %s272_s23  ;;  %s271_s9 = int_to_ptr.hbm [resolvable:$true] %s270_s9 }
  0x1f   : > { %p1196_p9 = pnand %p849_p7, %p40_p3  ;;  %s261_s18 = scalar_lea.sflag [#allocation3], %s260_s14 }
  0x20   : > { %s964_s19 = sshra.s32 %s271_s9, 4  ;;  %s971_s17 = scalar_lea.hbm %s1308_s0, 64  ;;  %s965_s19 = int_to_ptr.hbm [resolvable:$true] %s964_s19 }
  0x21   : > { %s966_s1 = scalar_lea.hbm %s965_s19, 32  ;;  %p968_p10 = pneg %p1196_p9 }
  0x22   : > { %p967_p2 = scmp.ne.s32.totalorder %s965_s19, %s966_s1  ;;  %p972_p0 = scmp.lt.s32.totalorder %s965_s19, %s1308_s0 }
  0x23   : > { %p973_p3 = scmp.lt.s32.totalorder %s971_s17, %s966_s1 }
  0x24   : > { %p969_p12 = pnand %p968_p10, %p967_p2 }
  0x25   : > { %p974_p7 = por %p973_p3, %p972_p0 }
  0x26   : > { %p970_p13 = pneg %p969_p12 }
  0x28   : > { %p975_p11 = pnand %p974_p7, %p970_p13 }
  0x2a   : > { %978 = shalt.err (!%p975_p11)
}
  0x2b   : > { %s1325_s14 = smov 8   ;;  %s1326_s22 = smov 128  }
  0x2c   : > { %842 = dma.hbm_to_vmem [thread:$0]  (!%p1196_p9), %s271_s9, 512, %s273_s23, %s261_s18, %s1326_s22, %s1326_s22, %s1325_s14  }
  0x2d   : > { %284 = sbr.rel (%p1157_p8) target bundleno = 634 (0x27a), region = 48  ;;  %s1216_s16 = sand.u32 (!%p1157_p8), 1, %s1056_s25  }
  0x2e   : > { %s737_s1 = sshll.u32 (!%p1157_p8), %s1216_s16, 5  ;;  %s287_s19 = scalar_lea.sflag (!%p1157_p8), [#allocation3], %s1216_s16 }
  0x2f   : > { %s1222_s15 = scalar_lea.vmem (!%p1157_p8), [#allocation2], %s737_s1 }
  0x32   : > { %1039 = dma.done.wait (%p1144_p4), %s287_s19, 512  }
  0x33   : > { %1041 = vsyncadd (%p1144_p4), %s287_s19, 4294966784 }
  0x34   : > { %1043 = dma.done.wait (%p45_p1), [#allocation6], 1536  }
  0x35   : > { %1045 = vsyncadd (%p45_p1), [#allocation6], 4294965760  ;;  %v801_v0 = vld [vmem:[#allocation5 + $0x14] sm:$0xf]  ;;  %v753_v1 = vld [vmem:[#allocation5 + $0x18] sm:$0xf0] }
  0x36   : > { %v799_v2 = vld [vmem:[#allocation5 + $0x4] sm:$0xf]  ;;  %v756_v3 = vor.u32 %v801_v0, %v753_v1  ;;  %v745_v4 = vld [vmem:[#allocation5 + $0x8] sm:$0xf0]  ;;  %v810_v5 = vld [vmem:[#allocation7 + $0x38] sm:$0xff]  ;;  %vm371_vm0 = vcmask 261120   ;;  %v529_v0 = vlaneseq }
  0x37   : > { %v748_v6 = vor.u32 %v799_v2, %v745_v4  ;;  %v335_v7 = vld [vmem:[%s1222_s15] sm:$0xff]  ;;  %v336_v8 = vld [vmem:[%s1222_s15 + $0x8] sm:$0xff]  ;;  %490 = vmatpush.bf16.msra.mxu2 %v810_v5  ;;  %v809_v9 = vld [vmem:[#allocation7 + $0x30] sm:$0xff]  ;;  %812 = vmatpush.bf16.msra.mxu3 %v810_v5  ;;  %s1266_s21 = scalar_lea.vmem [#allocation8], %s737_s1  ;;  %s811_s14 = sshll.u32 %s1135_s28, 5 }
  0x38   : > { %403 = vmatpush.bf16.msra.mxu1 %v756_v3  ;;  %v339_v10 = vpack.c.bf16 %v336_v8, %v335_v7  ;;  %v808_v11 = vld [vmem:[#allocation7 + $0x28] sm:$0xff]  ;;  %v807_v12 = vld [vmem:[#allocation7 + $0x20] sm:$0xff]  ;;  %v337_v13 = vld [vmem:[%s1222_s15 + $0x10] sm:$0xff]  ;;  %v530_v1 = vand.u32 127, %v529_v0  ;;  %s632_s19 = scalar_lea.hbm %s1315_s7, %s811_s14  ;;  %s621_s28 = scalar_lea.sflag [#allocation4], %s1216_s16 }
  0x39   : > { %v338_v14 = vld [vmem:[%s1222_s15 + $0x18] sm:$0xff]  ;;  %v805_v17 = vld [vmem:[#allocation7 + $0x10] sm:$0xff]  ;;  %v804_v21 = vld [vmem:[#allocation7 + $0x8] sm:$0xff]  ;;  %s633_s15 = sshll.u32 %s1266_s21, 4  ;;  %s635_s30 = sshll.u32 %s632_s19, 4  ;;  %s634_s15 = int_to_ptr.vmem [resolvable:$true] %s633_s15  ;;  %s636_s30 = int_to_ptr.hbm [resolvable:$true] %s635_s30 }
  0x3a   : > { %v340_v15 = vpack.c.bf16 %v338_v14, %v337_v13  ;;  %v806_v16 = vld [vmem:[#allocation7 + $0x18] sm:$0xff]  ;;  %v751_v18 = vld [vmem:[#allocation5 + $0x10] sm:$0xf]  ;;  %v743_v22 = vld [vmem:[#allocation5] sm:$0xf]  ;;  %vm531_vm1 = vcmp.lt.s32.totalorder %v530_v1, 32 }
  0x3b   : > { %491 = vmatpush.bf16.msra.mxu2 %v809_v9  ;;  %813 = vmatpush.bf16.msra.mxu3 %v809_v9  ;;  %v802_v19 = vld [vmem:[#allocation5 + $0x14] sm:$0xf0]  ;;  %v800_v23 = vld [vmem:[#allocation5 + $0x4] sm:$0xf0]  ;;  %v803_v25 = vld [vmem:[#allocation7] sm:$0xff]  ;;  %s1008_s12 = sshra.s32 %s636_s30, 4  ;;  %s1009_s12 = int_to_ptr.hbm [resolvable:$true] %s1008_s12 }
  0x3c   : > { %404 = vmatpush.bf16.msra.mxu1 %v748_v6  ;;  %v752_v20 = vor.u32 %v802_v19, %v751_v18  ;;  %v744_v24 = vor.u32 %v800_v23, %v743_v22  ;;  %v345_v26 = vld [vmem:[%s1310_s2] sm:$0x3]  ;;  %s1010_s18 = scalar_lea.hbm %s1009_s12, 32  ;;  %s1014_s10 = scalar_lea.hbm %s1315_s7, 64 }
  0x3d   : > { %v348_v28 = vperm.slane %v345_v26, 1  ;;  %v347_v43 = vperm.slane %v345_v26, 0  ;;  %v893_v44 = vld [vmem:[%s1312_s4] ss:$0 sm:$0xff]  ;;  %p1011_p1 = scmp.ne.s32.totalorder %s1009_s12, %s1010_s18  ;;  %p1015_p11 = scmp.lt.s32.totalorder %s1009_s12, %s1315_s7 }
  0x3e   : > { %384 = vmatpush.bf16.msra.mxu0 %v752_v20  ;;  %p1016_p9 = scmp.lt.s32.totalorder %s1014_s10, %s1010_s18 }
  0x3f   : > { %759 = vmatmul.msk.bf16.vlgmr.msra.gmra.mxu1 %vm371_vm0, %v339_v10  ;;  %492 = vmatpush.bf16.msra.mxu2 %v808_v11  ;;  %p1012_p4 = pnand %p1011_p1, %p1186_p5 }
  0x40   : > { %814 = vmatpush.bf16.msra.mxu3 %v808_v11  ;;  %p1017_p2 = por %p1016_p9, %p1015_p11 }
  0x41   : > { %p1013_p8 = pneg %p1012_p4 }
  0x42   : > { %385 = vmatpush.bf16.msra.mxu0 %v744_v24 }
  0x43   : > { %493 = vmatpush.bf16.msra.mxu2 %v807_v12  ;;  %p1018_p10 = pnand %p1017_p2, %p1013_p8 }
  0x44   : > { %815 = vmatpush.bf16.msra.mxu3 %v807_v12 }
  0x45   : > { %757 = vmatmul.msk.bf16.vlgmr.msra.gmra.mxu0 %vm371_vm0, %v339_v10 }
  0x47   : > { %494 = vmatpush.bf16.msra.mxu2 %v806_v16 }
  0x48   : > { %816 = vmatpush.bf16.msra.mxu3 %v806_v16 }
  0x4b   : > { %495 = vmatpush.bf16.msra.mxu2 %v805_v17 }
  0x4c   : > { %817 = vmatpush.bf16.msra.mxu3 %v805_v17 }
  0x4f   : > { %760 = vmatmul.msk.bf16.gmra.mxu1 %vm371_vm0, %v340_v15  ;;  %496 = vmatpush.bf16.msra.mxu2 %v804_v21 }
  0x50   : > { %818 = vmatpush.bf16.msra.mxu3 %v804_v21 }
  0x53   : > { %497 = vmatpush.bf16.msra.mxu2 %v803_v25 }
  0x54   : > { %819 = vmatpush.bf16.msra.mxu3 %v803_v25 }
  0x55   : > { %758 = vmatmul.msk.bf16.gmra.mxu0 %vm371_vm0, %v340_v15 }
  0xbc   : > { %v406_v27 = vpop.f32.mrf.mxu1 }
  0xbd   : > { %v407_v29 = vadd.f32 %v406_v27, %v348_v28 }
  0xbf   : > { %v416_v32 = vmax.f32 %v407_v29, 0.0 }
  0xc2   : > { %v387_v42 = vpop.f32.mrf.mxu0 }
  0xc3   : > { %v388_v45 = vadd.f32 %v387_v42, %v347_v43  ;;  %v895_v42 = vld [vmem:[%s1314_s6] ss:$0 sm:$0xff] }
  0xc4   : > { %v408_v30 = vpop.f32.mrf.mxu1 }
  0xc5   : > { %v409_v31 = vadd.f32 %v408_v30, %v348_v28 }
  0xc7   : > { %v417_v33 = vmax.f32 %v409_v31, 0.0 }
  0xc9   : > { %v420_v34 = vpack.c.bf16 %v417_v33, %v416_v32 }
  0xca   : > { %v389_v48 = vpop.f32.mrf.mxu0 }
  0xcb   : > { %498 = vmatmul.bf16.vlgmr.msra.gmra.mxu2 %v420_v34  ;;  %v390_v51 = vadd.f32 %v389_v48, %v347_v43 }
  0xcc   : > { %v411_v35 = vpop.f32.mrf.mxu1 }
  0xcd   : > { %v412_v36 = vadd.f32 %v411_v35, %v348_v28 }
  0xcf   : > { %v418_v39 = vmax.f32 %v412_v36, 0.0 }
  0xd2   : > { %v392_v54 = vpop.f32.mrf.mxu0 }
  0xd3   : > { %v393_v55 = vadd.f32 %v392_v54, %v347_v43 }
  0xd4   : > { %v413_v37 = vpop.f32.mrf.mxu1 }
  0xd5   : > { %v414_v38 = vadd.f32 %v413_v37, %v348_v28 }
  0xd7   : > { %v419_v40 = vmax.f32 %v414_v38, 0.0 }
  0xd9   : > { %v421_v41 = vpack.c.bf16 %v419_v40, %v418_v39  ;;  %v894_v39 = vld [vmem:[%s1313_s5] ss:$0 sm:$0xff] }
  0xda   : > { %v394_v59 = vpop.f32.mrf.mxu0 }
  0xdb   : > { %503 = vmatmul.bf16.vlgmr.msra.gmra.mxu3 %v421_v41  ;;  %v395_v61 = vadd.f32 %v394_v59, %v347_v43 }
 0x14e   : > { %v499_v46 = vpop.f32.mrf.mxu2 }
 0x14f   : > { %v500_v47 = vadd.f32 %v893_v44, %v499_v46 }
 0x151   : > { %v509_v49 = vadd.f32 %v500_v47, %v388_v45 }
 0x153   : > { %513 = vadd.xlane.f32.xlu0 %v509_v49 }
 0x156   : > { %v501_v50 = vpop.f32.mrf.mxu2 }
 0x157   : > { %v502_v52 = vadd.f32 %v893_v44, %v501_v50 }
 0x159   : > { %v510_v53 = vadd.f32 %v502_v52, %v390_v51 }
 0x15b   : > { %515 = vadd.xlane.f32.xlu0 %v510_v53 }
 0x15e   : > { %v504_v56 = vpop.f32.mrf.mxu3 }
 0x15f   : > { %v505_v57 = vadd.f32 %v893_v44, %v504_v56 }
 0x161   : > { %v511_v58 = vadd.f32 %v505_v57, %v393_v55 }
 0x163   : > { %517 = vadd.xlane.f32.xlu1 %v511_v58 }
 0x166   : > { %v506_v60 = vpop.f32.mrf.mxu3 }
 0x167   : > { %v507_v62 = vadd.f32 %v893_v44, %v506_v60 }
 0x169   : > { %v512_v63 = vadd.f32 %v507_v62, %v395_v61 }
 0x16b   : > { %519 = vadd.xlane.f32.xlu1 %v512_v63 }
 0x1c6   : > { %v514_v2 = vpop.xlane.xlu0 %513 }
 0x1c7   : > { %v521_v3 = vmul.f32 0.03125, %v514_v2 }
 0x1c9   : > { %v525_v4 = vsub.f32 %v509_v49, %v521_v3 }
 0x1cb   : > { %v532_v5 = vsel %vm531_vm1, %v525_v4, 0.0 }
 0x1cc   : > { %v536_v6 = vmul.f32 %v532_v5, %v532_v5 }
 0x1ce   : > { %540 = vadd.xlane.f32.xlu2 %v536_v6  ;;  %v516_v7 = vpop.xlane.xlu0 %515 }
 0x1cf   : > { %v522_v8 = vmul.f32 0.03125, %v516_v7 }
 0x1d1   : > { %v526_v9 = vsub.f32 %v510_v53, %v522_v8 }
 0x1d3   : > { %v533_v10 = vsel %vm531_vm1, %v526_v9, 0.0 }
 0x1d4   : > { %v537_v11 = vmul.f32 %v533_v10, %v533_v10 }
 0x1d6   : > { %v518_v12 = vpop.xlane.xlu1 %517  ;;  %542 = vadd.xlane.f32.xlu2 %v537_v11 }
 0x1d7   : > { %v523_v13 = vmul.f32 0.03125, %v518_v12 }
 0x1d9   : > { %v527_v14 = vsub.f32 %v511_v58, %v523_v13 }
 0x1db   : > { %v1249_v15 = vsel %vm531_vm1, %v527_v14, 0.0 }
 0x1dc   : > { %v538_v16 = vmul.f32 %v1249_v15, %v1249_v15 }
 0x1de   : > { %v520_v17 = vpop.xlane.xlu1 %519  ;;  %544 = vadd.xlane.f32.xlu0 %v538_v16 }
 0x1df   : > { %v524_v18 = vmul.f32 0.03125, %v520_v17 }
 0x1e1   : > { %v528_v19 = vsub.f32 %v512_v63, %v524_v18 }
 0x1e3   : > { %v1254_v20 = vsel %vm531_vm1, %v528_v19, 0.0 }
 0x1e4   : > { %v539_v21 = vmul.f32 %v1254_v20, %v1254_v20 }
 0x1e6   : > { %546 = vadd.xlane.f32.xlu1 %v539_v21 }
 0x241   : > { %v541_v22 = vpop.xlane.xlu2 %540 }
 0x242   : > { %v548_v23 = vmul.f32 0.03125, %v541_v22 }
 0x244   : > { %v552_v24 = vadd.f32 1e-05, %v548_v23 }
 0x246   : > { %896 = vrsqrt.f32 %v552_v24  ;;  %vm562_vm3 = vweird.f32 %v552_v24 }
 0x249   : > { %v543_v25 = vpop.xlane.xlu2 %542 }
 0x24a   : > { %v549_v26 = vmul.f32 0.03125, %v543_v25 }
 0x24c   : > { %v897_v27 = vpop.eup %896  ;;  %v553_v28 = vadd.f32 1e-05, %v549_v26 }
 0x24d   : > { %v557_v29 = vmul.f32 %v897_v27, %v552_v24  ;;  %vm563_vm2 = vweird.f32 %v897_v27 }
 0x24e   : > { %898 = vrsqrt.f32 %v553_v28  ;;  %vm564_vm4 = vmor %vm562_vm3, %vm563_vm2  ;;  %vm572_vm6 = vweird.f32 %v553_v28 }
 0x24f   : > { %v558_v30 = vmul.f32 %v897_v27, %v557_v29 }
 0x251   : > { %v559_v31 = vmul.f32 0.5, %v558_v30  ;;  %v545_v32 = vpop.xlane.xlu0 %544 }
 0x252   : > { %v550_v33 = vmul.f32 0.03125, %v545_v32 }
 0x253   : > { %v560_v34 = vsub.f32 1.5, %v559_v31 }
 0x254   : > { %v899_v35 = vpop.eup %898  ;;  %v554_v36 = vadd.f32 1e-05, %v550_v33 }
 0x255   : > { %v561_v37 = vmul.f32 %v897_v27, %v560_v34  ;;  %v567_v38 = vmul.f32 %v899_v35, %v553_v28  ;;  %vm573_vm5 = vweird.f32 %v899_v35 }
 0x256   : > { %900 = vrsqrt.f32 %v554_v36  ;;  %vm574_vm7 = vmor %vm572_vm6, %vm573_vm5  ;;  %vm582_vm9 = vweird.f32 %v554_v36 }
 0x257   : > { %v565_v40 = vsel %vm564_vm4, %v897_v27, %v561_v37  ;;  %v568_v41 = vmul.f32 %v899_v35, %v567_v38 }
 0x258   : > { %v596_v43 = vmul.f32 %v565_v40, %v532_v5 }
 0x259   : > { %v569_v44 = vmul.f32 0.5, %v568_v41  ;;  %v547_v45 = vpop.xlane.xlu1 %546 }
 0x25a   : > { %v604_v46 = vmul.f32 %v894_v39, %v596_v43  ;;  %v551_v47 = vmul.f32 0.03125, %v547_v45 }
 0x25b   : > { %v570_v48 = vsub.f32 1.5, %v569_v44 }
 0x25c   : > { %v901_v49 = vpop.eup %900  ;;  %v612_v50 = vadd.f32 %v895_v42, %v604_v46  ;;  %v555_v51 = vadd.f32 1e-05, %v551_v47 }
 0x25d   : > { %v571_v52 = vmul.f32 %v899_v35, %v570_v48  ;;  %v577_v53 = vmul.f32 %v901_v49, %v554_v36  ;;  %vm583_vm8 = vweird.f32 %v901_v49 }
 0x25e   : > { %616 = vst [vmem:[%s1266_s21] sm:$0xff] %v612_v50  ;;  %902 = vrsqrt.f32 %v555_v51  ;;  %vm584_vm10 = vmor %vm582_vm9, %vm583_vm8  ;;  %vm592_vm12 = vweird.f32 %v555_v51 }
 0x25f   : > { %v575_v54 = vsel %vm574_vm7, %v899_v35, %v571_v52  ;;  %v578_v55 = vmul.f32 %v901_v49, %v577_v53 }
 0x260   : > { %v597_v56 = vmul.f32 %v575_v54, %v533_v10 }
 0x261   : > { %v579_v57 = vmul.f32 0.5, %v578_v55 }
 0x262   : > { %v605_v58 = vmul.f32 %v894_v39, %v597_v56 }
 0x263   : > { %v580_v59 = vsub.f32 1.5, %v579_v57 }
 0x264   : > { %v903_v60 = vpop.eup %902  ;;  %v613_v61 = vadd.f32 %v895_v42, %v605_v58 }
 0x265   : > { %v581_v62 = vmul.f32 %v901_v49, %v580_v59  ;;  %v587_v63 = vmul.f32 %v903_v60, %v555_v51  ;;  %vm593_vm11 = vweird.f32 %v903_v60 }
 0x266   : > { %617 = vst [vmem:[%s1266_s21 + $0x8] sm:$0xff] %v613_v61  ;;  %vm594_vm13 = vmor %vm592_vm12, %vm593_vm11 }
 0x267   : > { %v585_v0 = vsel %vm584_vm10, %v901_v49, %v581_v62  ;;  %v588_v1 = vmul.f32 %v903_v60, %v587_v63 }
 0x268   : > { %v598_v2 = vmul.f32 %v585_v0, %v1249_v15 }
 0x269   : > { %v589_v3 = vmul.f32 0.5, %v588_v1 }
 0x26a   : > { %v606_v4 = vmul.f32 %v894_v39, %v598_v2 }
 0x26b   : > { %v590_v5 = vsub.f32 1.5, %v589_v3 }
 0x26c   : > { %v614_v6 = vadd.f32 %v895_v42, %v606_v4 }
 0x26d   : > { %v591_v7 = vmul.f32 %v903_v60, %v590_v5 }
 0x26e   : > { %618 = vst [vmem:[%s1266_s21 + $0x10] sm:$0xff] %v614_v6 }
 0x26f   : > { %v595_v8 = vsel %vm594_vm13, %v903_v60, %v591_v7 }
 0x270   : > { %v599_v9 = vmul.f32 %v595_v8, %v1254_v20 }
 0x272   : > { %v607_v10 = vmul.f32 %v894_v39, %v599_v9 }
 0x274   : > { %v615_v11 = vadd.f32 %v895_v42, %v607_v10 }
 0x276   : > { %619 = vst [vmem:[%s1266_s21 + $0x18] sm:$0xff] %v615_v11 }
 0x277   : > { %1021 = shalt.err (!%p1018_p10)
}
 0x278   : > { %s1072_s16 = smov 128   ;;  %s1073_s21 = smov 8  }
 0x279   : > { %830 = dma.vmem_to_hbm [thread:$0]  (%p1186_p5), %s634_s15, 512, %s636_s30, %s621_s28, %s1072_s16, %s1072_s16, %s1073_s21  }
 0x27a PF: > { %s650_s14 = sand.u32 1, %s1052_s24   ;;  %p1327_p12 = scmp.ge.s32.totalorder %s1064_s27, 2 }
 0x27b   : > { %s651_s22 = scalar_lea.sflag [#allocation4], %s650_s14 }
 0x27c   : > { %p844_p13 = pnand %p1327_p12, %p1149_p6 }
 0x27e   : > { %p845_p0 = pneg %p844_p13 }
 0x280   : > { %1047 = dma.done.wait (%p845_p0), %s651_s22, 512  }
 0x281   : > { %1049 = vsyncadd (%p845_p0), %s651_s22, 4294966784  ;;  %p21_p3 = scmp.ge.s32.totalorder %s1173_s29, 4   ;;  %s1328_s24 = smov %s1056_s25 }
 0x282   : > { %s1329_s25 = smov %s1060_s26  ;;  %s1330_s26 = smov %s1182_s13 }
 0x283   : > { %s1331_s27 = smov %s1173_s29  ;;  %23 = sbr.rel (!%p21_p3) target bundleno = 8 (0x8), region = 101 }
 0x288   :  { %657 = vsyncpa [#allocation3], 1 }
 0x289   :  { %659 = vsyncpa [#allocation3 + $0x1], 1 }
 0x28a   :  { %660 = vsyncpa [#allocation6], 1 }
 0x28b   :  { %661 = vsyncpa [#allocation4], 1 }
 0x28c   :  { %663 = vsyncpa [#allocation4 + $0x1], 1 }

</bundles_post_ra>
